<compile_context>
chip_gen: v7x
topology: tpu7x:2x2x1
jax: 0.10.0
libtpu: 0.0.40
codegen_flags: <defaults>
</compile_context>

<pallas_src>
import functools

import jax
import jax.numpy as jnp
from jax import lax
from jax.experimental import pallas as pl
from jax.experimental.pallas import tpu as pltpu

SUBLANES = 8  # TPU vreg sublane count


def _round_up(x, m):
    return ((x + m - 1) // m) * m


def _chunk(x_ref, o_ref, w1, b1, w2, b2, w3, b3, start, size):
    """Forward pass for `size` rows of the current batch tile (start may be dynamic)."""
    x = x_ref[pl.ds(start, size), :].astype(w1.dtype)
    h1 = jnp.dot(x, w1, preferred_element_type=jnp.float32) + b1      # f32
    h1 = jnp.maximum(h1, 0.0).astype(w2.dtype)                        # ReLU
    h2 = jnp.dot(h1, w2, preferred_element_type=jnp.float32) + b2     # f32
    h2 = jnp.maximum(h2, 0.0).astype(w3.dtype)                        # ReLU
    out = jnp.dot(h2, w3, preferred_element_type=jnp.float32) + b3    # f32 logits
    o_ref[pl.ds(start, size), :] = out.astype(o_ref.dtype)


def mlp_kernel(x_ref, w1_ref, b1_ref, w2_ref, b2_ref, w3_ref, b3_ref, o_ref,
               *, row_chunk):
    """One batch tile; weights/biases are VMEM-resident across the batch grid.

    x_ref:  (tile_b, num_inputs)   f32 (cast to compute dtype in-kernel)
    w1_ref: (num_inputs, 30)       b1_ref: (1, 30)   f32
    w2_ref: (30, 20)               b2_ref: (1, 20)   f32
    w3_ref: (20, num_outputs)      b3_ref: (1, num_outputs)  f32
    o_ref:  (tile_b, num_outputs)  f32
    """
    w1, w2, w3 = w1_ref[...], w2_ref[...], w3_ref[...]
    b1, b2, b3 = b1_ref[...], b2_ref[...], b3_ref[...]

    tile_b = x_ref.shape[0]
    n_full = tile_b // row_chunk          # static
    rem = tile_b - n_full * row_chunk     # static, multiple of 8

    if n_full > 0:
        # Hoist bias broadcasts out of the loop (JAX does not CSE broadcast_in_dim).
        b1f = jnp.broadcast_to(b1, (row_chunk, b1.shape[1]))
        b2f = jnp.broadcast_to(b2, (row_chunk, b2.shape[1]))
        b3f = jnp.broadcast_to(b3, (row_chunk, b3.shape[1]))

        def body(c, carry):
            start = pl.multiple_of(c * row_chunk, row_chunk)
            _chunk(x_ref, o_ref, w1, b1f, w2, b2f, w3, b3f, start, row_chunk)
            return carry

        lax.fori_loop(0, n_full, body, 0, unroll=(n_full <= 8))

    if rem > 0:  # static remainder chunk
        _chunk(x_ref, o_ref, w1, b1, w2, b2, w3, b3, n_full * row_chunk, rem)


def prepare_params(params, compute_dtype=jnp.float32):
    """One-time glue: transpose PyTorch (out,in) weights to (in,out), cast weights to the
    compute dtype, keep biases f32 as (1, out). No output-lane padding."""
    w1 = params["w1"].T.astype(compute_dtype)
    w2 = params["w2"].T.astype(compute_dtype)
    w3 = params["w3"].T.astype(compute_dtype)
    b1 = params["b1"][None, :].astype(jnp.float32)
    b2 = params["b2"][None, :].astype(jnp.float32)
    b3 = params["b3"][None, :].astype(jnp.float32)
    return dict(w1=w1, b1=b1, w2=w2, b2=b2, w3=w3, b3=b3)


@functools.partial(jax.jit, static_argnames=("tile_b",))
def neural_network_forward(x, prepared, *, tile_b=8192):
    """x: (B, num_inputs) f32. Returns (B, num_outputs) f32 logits."""
    B, num_inputs = x.shape
    num_outputs = prepared["w3"].shape[1]

    # Batch tile: multiple of 8 sublanes; keep >=2 grid steps when B allows (v7x has
    # 2 TensorCores), and never larger than the (rounded-up) batch itself.
    tile_b = min(tile_b, _round_up(pl.cdiv(B, 2), SUBLANES), _round_up(B, SUBLANES))
    tile_b = max(_round_up(tile_b, SUBLANES), SUBLANES)
    grid = (pl.cdiv(B, tile_b),)          # ragged last block: reads don't-care, writes masked
    row_chunk = min(128, tile_b)          # bounds vreg pressure inside the kernel

    # Weights/biases: same block every grid step -> stay resident in VMEM.
    resident = lambda a: pl.BlockSpec(a.shape, lambda i: (0,) * a.ndim)

    out = pl.pallas_call(
        functools.partial(mlp_kernel, row_chunk=row_chunk),
        out_shape=jax.ShapeDtypeStruct((B, num_outputs), jnp.float32),
        grid=grid,
        in_specs=[
            pl.BlockSpec((tile_b, num_inputs), lambda i: (i, 0)),
            resident(prepared["w1"]), resident(prepared["b1"]),
            resident(prepared["w2"]), resident(prepared["b2"]),
            resident(prepared["w3"]), resident(prepared["b3"]),
        ],
        out_specs=pl.BlockSpec((tile_b, num_outputs), lambda i: (i, 0)),
        compiler_params=pltpu.CompilerParams(
            dimension_semantics=("parallel",),   # shards batch tiles across TCs (v7x)
            vmem_limit_bytes=32 * 1024 * 1024,   # safe on v7x's 64 MiB VMEM
        ),
    )(x, prepared["w1"], prepared["b1"], prepared["w2"], prepared["b2"],
      prepared["w3"], prepared["b3"])

    return out


def init_params(key, num_inputs, num_outputs):
    """Deterministic PyTorch-Linear-style init: U(-1/sqrt(fan_in), +1/sqrt(fan_in))."""
    dims = [(30, num_inputs), (20, 30), (num_outputs, 20)]
    params = {}
    for i, (fan_out, fan_in) in enumerate(dims, start=1):
        key, kw, kb = jax.random.split(key, 3)
        bound = 1.0 / jnp.sqrt(jnp.float32(fan_in))
        params[f"w{i}"] = jax.random.uniform(
            kw, (fan_out, fan_in), jnp.float32, -bound, bound)
        params[f"b{i}"] = jax.random.uniform(
            kb, (fan_out,), jnp.float32, -bound, bound)
    return params


def reference_forward(x, params):
    """Pure-JAX reference (mirrors the PyTorch forward exactly, f32)."""
    h = jnp.maximum(x @ params["w1"].T + params["b1"], 0.0)
    h = jnp.maximum(h @ params["w2"].T + params["b2"], 0.0)
    return h @ params["w3"].T + params["b3"]


if __name__ == "__main__":
    # Shapes consistent with appendix-A/A7_train.py: NeuralNetwork(num_inputs=2, num_outputs=2)
    num_inputs, num_outputs = 2, 2
    key = jax.random.PRNGKey(0)
    key, kx1, kx2 = jax.random.split(key, 3)
    params = init_params(key, num_inputs, num_outputs)

    # --- small batch, f32 compute (tight tolerance) ---
    x_small = jax.random.normal(kx1, (8, num_inputs), dtype=jnp.float32)
    prep_f32 = prepare_params(params, jnp.float32)
    logits = jax.block_until_ready(neural_network_forward(x_small, prep_f32))
    ref = reference_forward(x_small, params)
    assert logits.shape == (8, num_outputs)
    assert jnp.allclose(logits, ref, atol=1e-5, rtol=1e-5), "f32 mismatch vs JAX reference"

    # --- multi-tile batch with a ragged last block (grid=3, 44-row remainder), f32 ---
    x_big = jax.random.normal(kx2, (300, num_inputs), dtype=jnp.float32)
    logits_big = jax.block_until_ready(
        neural_network_forward(x_big, prep_f32, tile_b=128))
    ref_big = reference_forward(x_big, params)
    assert logits_big.shape == (300, num_outputs)
    assert jnp.allclose(logits_big, ref_big, atol=1e-5, rtol=1e-5), "tiled f32 mismatch"

    # --- same batch, default (large) tile_b path: 2 grid steps, ragged last block ---
    logits_def = jax.block_until_ready(neural_network_forward(x_big, prep_f32))
    assert jnp.allclose(logits_def, ref_big, atol=1e-5, rtol=1e-5), "default-tile mismatch"

    # --- bf16 weights (f32 x in HBM, in-kernel cast, f32 accumulation), loose tolerance ---
    prep_bf16 = prepare_params(params, jnp.bfloat16)
    logits_bf16 = jax.block_until_ready(neural_network_forward(x_small, prep_bf16))
    assert jnp.allclose(logits_bf16, ref, atol=5e-2, rtol=5e-2), "bf16 mismatch vs reference"

    print("KERNEL_OK")
</pallas_src>

<mosaic_0001>
module attributes {stable_mosaic.version = 11 : i64} {
  func.func @mlp_kernel(%arg0: i32, %arg1: memref<8x2xf32, #tpu.memory_space<vmem>>, %arg2: memref<2x30xf32, #tpu.memory_space<vmem>>, %arg3: memref<1x30xf32, #tpu.memory_space<vmem>>, %arg4: memref<30x20xf32, #tpu.memory_space<vmem>>, %arg5: memref<1x20xf32, #tpu.memory_space<vmem>>, %arg6: memref<20x2xf32, #tpu.memory_space<vmem>>, %arg7: memref<1x2xf32, #tpu.memory_space<vmem>>, %arg8: memref<8x2xf32, #tpu.memory_space<vmem>>) attributes {dimension_semantics = [#tpu.dimension_semantics<parallel>], iteration_bounds = array<i64: 1>, scalar_prefetch = 0 : i64, scratch_operands = 0 : i64, tpu.core_type = #tpu.core_type<tc>, window_params = [{transform_indices = @transform_0, window_bounds = array<i64: 8, 2>}, {pipeline_mode = #tpu.pipeline_mode<synchronous>, transform_indices = @transform_1, window_bounds = array<i64: 2, 30>}, {pipeline_mode = #tpu.pipeline_mode<synchronous>, transform_indices = @transform_2, window_bounds = array<i64: 1, 30>}, {pipeline_mode = #tpu.pipeline_mode<synchronous>, transform_indices = @transform_3, window_bounds = array<i64: 30, 20>}, {pipeline_mode = #tpu.pipeline_mode<synchronous>, transform_indices = @transform_4, window_bounds = array<i64: 1, 20>}, {pipeline_mode = #tpu.pipeline_mode<synchronous>, transform_indices = @transform_5, window_bounds = array<i64: 20, 2>}, {pipeline_mode = #tpu.pipeline_mode<synchronous>, transform_indices = @transform_6, window_bounds = array<i64: 1, 2>}, {transform_indices = @transform_7, window_bounds = array<i64: 8, 2>}]} {
    %c0 = arith.constant 0 : index
    %c0_0 = arith.constant 0 : index
    %0 = vector.load %arg2[%c0, %c0_0] : memref<2x30xf32, #tpu.memory_space<vmem>>, vector<2x30xf32>
    %c0_1 = arith.constant 0 : index
    %c0_2 = arith.constant 0 : index
    %1 = vector.load %arg4[%c0_1, %c0_2] : memref<30x20xf32, #tpu.memory_space<vmem>>, vector<30x20xf32>
    %c0_3 = arith.constant 0 : index
    %c0_4 = arith.constant 0 : index
    %2 = vector.load %arg6[%c0_3, %c0_4] : memref<20x2xf32, #tpu.memory_space<vmem>>, vector<20x2xf32>
    %c0_5 = arith.constant 0 : index
    %c0_6 = arith.constant 0 : index
    %3 = vector.load %arg3[%c0_5, %c0_6] : memref<1x30xf32, #tpu.memory_space<vmem>>, vector<1x30xf32>
    %c0_7 = arith.constant 0 : index
    %c0_8 = arith.constant 0 : index
    %4 = vector.load %arg5[%c0_7, %c0_8] : memref<1x20xf32, #tpu.memory_space<vmem>>, vector<1x20xf32>
    %c0_9 = arith.constant 0 : index
    %c0_10 = arith.constant 0 : index
    %5 = vector.load %arg7[%c0_9, %c0_10] : memref<1x2xf32, #tpu.memory_space<vmem>>, vector<1x2xf32>
    %6 = vector.shape_cast %3 : vector<1x30xf32> to vector<1x30xf32>
    %7 = vector.broadcast %6 : vector<1x30xf32> to vector<8x30xf32>
    %8 = vector.shape_cast %4 : vector<1x20xf32> to vector<1x20xf32>
    %9 = vector.broadcast %8 : vector<1x20xf32> to vector<8x20xf32>
    %10 = vector.shape_cast %5 : vector<1x2xf32> to vector<1x2xf32>
    %11 = vector.broadcast %10 : vector<1x2xf32> to vector<8x2xf32>
    %c0_i32 = arith.constant 0 : i32
    %c8_i32 = arith.constant 8 : i32
    %12 = arith.muli %c0_i32, %c8_i32 : i32
    %13 = tpu.assume_multiple %12, 8 : i32
    %14 = arith.index_cast %13 : i32 to index
    %c0_11 = arith.constant 0 : index
    %15 = vector.load %arg1[%14, %c0_11] : memref<8x2xf32, #tpu.memory_space<vmem>>, vector<8x2xf32>
    %cst = arith.constant dense<0.000000e+00> : vector<8x30xf32>
    %16 = tpu.matmul %15, %0, %cst {dimension_numbers = #tpu.dot_dimension_numbers<[1], [0], [0], [1], [0, 0, 1, 1], [], []>} : vector<8x2xf32>, vector<2x30xf32>, vector<8x30xf32> -> vector<8x30xf32>
    %17 = arith.addf %16, %7 : vector<8x30xf32>
    %cst_12 = arith.constant 0.000000e+00 : f32
    %18 = vector.broadcast %cst_12 : f32 to vector<8x30xf32>
    %19 = arith.maximumf %17, %18 : vector<8x30xf32>
    %cst_13 = arith.constant dense<0.000000e+00> : vector<8x20xf32>
    %20 = tpu.matmul %19, %1, %cst_13 {dimension_numbers = #tpu.dot_dimension_numbers<[1], [0], [0], [1], [0, 0, 1, 1], [], []>} : vector<8x30xf32>, vector<30x20xf32>, vector<8x20xf32> -> vector<8x20xf32>
    %21 = arith.addf %20, %9 : vector<8x20xf32>
    %cst_14 = arith.constant 0.000000e+00 : f32
    %22 = vector.broadcast %cst_14 : f32 to vector<8x20xf32>
    %23 = arith.maximumf %21, %22 : vector<8x20xf32>
    %cst_15 = arith.constant dense<0.000000e+00> : vector<8x2xf32>
    %24 = tpu.matmul %23, %2, %cst_15 {dimension_numbers = #tpu.dot_dimension_numbers<[1], [0], [0], [1], [0, 0, 1, 1], [], []>} : vector<8x20xf32>, vector<20x2xf32>, vector<8x2xf32> -> vector<8x2xf32>
    %25 = arith.addf %24, %11 : vector<8x2xf32>
    %26 = arith.index_cast %13 : i32 to index
    %c0_16 = arith.constant 0 : index
    %27 = vector.load %arg8[%26, %c0_16] : memref<8x2xf32, #tpu.memory_space<vmem>>, vector<8x2xf32>
    tpu.vector_store %arg8[%26, %c0_16], %25 {strides = array<i32>} : memref<8x2xf32, #tpu.memory_space<vmem>>, vector<8x2xf32>,
    %c1_i32 = arith.constant 1 : i32
    return
  }
  func.func @transform_0(%arg0: i32) -> (i32, i32) {
    %c0_i32 = arith.constant 0 : i32
    %c0_i32_0 = arith.constant 0 : i32
    return %arg0, %c0_i32 : i32, i32
  }
  func.func @transform_1(%arg0: i32) -> (i32, i32) {
    %c0_i32 = arith.constant 0 : i32
    %c0_i32_0 = arith.constant 0 : i32
    %c0_i32_1 = arith.constant 0 : i32
    return %c0_i32, %c0_i32_0 : i32, i32
  }
  func.func @transform_2(%arg0: i32) -> (i32, i32) {
    %c0_i32 = arith.constant 0 : i32
    %c0_i32_0 = arith.constant 0 : i32
    %c0_i32_1 = arith.constant 0 : i32
    return %c0_i32, %c0_i32_0 : i32, i32
  }
  func.func @transform_3(%arg0: i32) -> (i32, i32) {
    %c0_i32 = arith.constant 0 : i32
    %c0_i32_0 = arith.constant 0 : i32
    %c0_i32_1 = arith.constant 0 : i32
    return %c0_i32, %c0_i32_0 : i32, i32
  }
  func.func @transform_4(%arg0: i32) -> (i32, i32) {
    %c0_i32 = arith.constant 0 : i32
    %c0_i32_0 = arith.constant 0 : i32
    %c0_i32_1 = arith.constant 0 : i32
    return %c0_i32, %c0_i32_0 : i32, i32
  }
  func.func @transform_5(%arg0: i32) -> (i32, i32) {
    %c0_i32 = arith.constant 0 : i32
    %c0_i32_0 = arith.constant 0 : i32
    %c0_i32_1 = arith.constant 0 : i32
    return %c0_i32, %c0_i32_0 : i32, i32
  }
  func.func @transform_6(%arg0: i32) -> (i32, i32) {
    %c0_i32 = arith.constant 0 : i32
    %c0_i32_0 = arith.constant 0 : i32
    %c0_i32_1 = arith.constant 0 : i32
    return %c0_i32, %c0_i32_0 : i32, i32
  }
  func.func @transform_7(%arg0: i32) -> (i32, i32) {
    %c0_i32 = arith.constant 0 : i32
    %c0_i32_0 = arith.constant 0 : i32
    return %arg0, %c0_i32 : i32, i32
  }
}

</mosaic_0001>

<bundles_post_ra>
// kernel: neural_network_forward.1
= control target key start
LH: loop header
LB: loop body
LE: loop exit
PB: predicated region body
PF: predicated region fallthrough
CT: control target
= control target key end

     0   :  { %vm60_vm0 = vcmask 1041408   ;;  %vm56_vm1 = vcmask 15360   ;;  %v356_v0 = vmov 0.0   ;;  %vm357_vm2 = vmmov 0   ;;  %s441_s1 = inlined_call_operand.vmem [shape: f32[2,30], index: 1, kind: input, shape index: {}]   ;;  %s442_s0 = inlined_call_operand.vmem [shape: f32[8,2], index: 0, kind: input, shape index: {}]   ;;  %s443_s3 = inlined_call_operand.vmem [shape: f32[30,20], index: 3, kind: input, shape index: {}]   ;;  %s444_s5 = inlined_call_operand.vmem [shape: f32[20,2], index: 5, kind: input, shape index: {}]   ;;  %s445_s2 = inlined_call_operand.vmem [shape: f32[1,30], index: 2, kind: input, shape index: {}]   ;;  %s446_s4 = inlined_call_operand.vmem [shape: f32[1,20], index: 4, kind: input, shape index: {}]   ;;  %s447_s6 = inlined_call_operand.vmem [shape: f32[1,2], index: 6, kind: input, shape index: {}]   ;;  %s448_s7 = inlined_call_operand.vmem [shape: f32[8,2], index: 7, kind: output, shape index: {}]  }
   0x1   :  { %317 = vmatprep.subr.mxu0 %v356_v0  ;;  %v26_v1 = vld [vmem:[%s441_s1] sm:$0x3]  ;;  %319 = vmatprep.mubr.msk.f32.mxu0 %vm357_vm2, %v356_v0  ;;  %v358_v4 = vmov 0.0|0.0   ;;  %v28_v5 = vld [vmem:[%s443_s3 + $0x8] sm:$0xff]  ;;  %v29_v7 = vld [vmem:[%s443_s3 + $0x10] sm:$0xff]  ;;  %vm139_vm3 = vcmask 1045504  }
   0x2   :  { %v55_v2 = vld [vmem:[%s442_s0] sm:$0xff]  ;;  %318 = vmatpush3.msk.msra.mxu0 %vm60_vm0, %v26_v1  ;;  %342 = vmatprep.subr.bf16.mxu1 %v358_v4  ;;  %v30_v8 = vld [vmem:[%s443_s3 + $0x18] sm:$0x3f]  ;;  %vm359_vm4 = vmmov 1   ;;  %v32_v11 = vld [vmem:[%s444_s5 + $0x8] sm:$0xff]  ;;  %vm135_vm6 = vcmask 244736  }
   0x3   :  { %v27_v3 = vld [vmem:[%s443_s3] sm:$0xff]  ;;  %320 = vmatmul.mubr.msk.f32.vlgmr.msra.gmra.mrb[0].mxu0 %vm56_vm1, %v55_v2  ;;  %330 = vmatprep.mubr.msk.f32.mxu1 %vm357_vm2, %v356_v0  ;;  %v346_v9 = vpack.c.bf16 %v30_v8, %v29_v7  ;;  %vm347_vm5 = vmpackc.low %vm139_vm3, %vm359_vm4  ;;  %v33_v18 = vld [vmem:[%s444_s5 + $0x10] sm:$0xf]  ;;  %vm218_vm7 = vcmask 1043456   ;;  %vm214_vm8 = vcmask 162816  }
   0x4   :  { %v343_v6 = vpack.c.bf16 %v28_v5, %v27_v3  ;;  %349 = vmatprep.subr.bf16.mxu0 %v358_v4  ;;  %339 = vmatprep.mubr.msk.f32.mxu0 %vm357_vm2, %v356_v0  ;;  %v31_v10 = vld [vmem:[%s444_s5] sm:$0xff] }
   0x5   :  { %v350_v12 = vpack.c.bf16 %v32_v11, %v31_v10  ;;  %v297_v13 = vld [vmem:[%s445_s2] ss:$0 sm:$0xff] }
   0x6   :  { %344 = vmatpush3.bf16.msra.mxu1 %v343_v6  ;;  %v298_v19 = vld [vmem:[%s446_s4] ss:$0 sm:$0xff] }
   0x7   :  { %345 = vmatprep.subr.bf16.mxu1 %v358_v4  ;;  %351 = vmatpush3.bf16.msra.mxu0 %v350_v12  ;;  %v299_v24 = vld [vmem:[%s447_s6] ss:$0 sm:$0xff] }
   0x8   :  { %337 = vmatprep.subr.mxu0 %v356_v0 }
   0xa   :  { %348 = vmatpush3.bf16.msk.msra.mxu1 %vm347_vm5, %v346_v9 }
   0xb   :  { %338 = vmatpush3.msk.msra.mxu0 %vm218_vm7, %v33_v18 }
  0xd6   :  { %v130_v14 = vpop.f32.mrb[0].mxu0 }
  0xd7   :  { %v131_v15 = vadd.f32 %v297_v13, %v130_v14  ;;  %v321_v16 = vpop.f32.mrb[1].mxu0 }
  0xd9   :  { %v134_v17 = vmax.f32 %v131_v15, 0.0 }
  0xdb   :  { %331 = vmatmul.mubr.msk.f32.vlgmr.msra.gmra.mrb[0].mxu1 %vm135_vm6, %v134_v17 }
 0x1ae   :  { %v209_v20 = vpop.f32.mrb[0].mxu1 }
 0x1af   :  { %v210_v21 = vadd.f32 %v298_v19, %v209_v20  ;;  %v332_v22 = vpop.f32.mrb[1].mxu1 }
 0x1b1   :  { %v213_v23 = vmax.f32 %v210_v21, 0.0 }
 0x1b3   :  { %340 = vmatmul.mubr.msk.f32.vlgmr.msra.gmra.mrb[2].mxu0 %vm214_vm8, %v213_v23 }
 0x286   :  { %v288_v25 = vpop.f32.mrb[2].mxu0 }
 0x287   :  { %v289_v26 = vadd.f32 %v299_v24, %v288_v25  ;;  %v341_v27 = vpop.f32.mrb[3].mxu0 }
 0x289   :  { %292 = vst.msk [vmem:[%s448_s7] sm:$0xff] %vm56_vm1, %v289_v26 }

</bundles_post_ra>
